<compile_context>
chip_gen: v7x
topology: tpu7x:2x2x1
jax: 0.10.0
libtpu: 0.0.40
codegen_flags: <defaults>
</compile_context>

<pallas_src>
import functools

import jax
import jax.numpy as jnp
from jax.experimental import pallas as pl
from jax.experimental.pallas import tpu as pltpu


# ----------------------------- Pallas kernels --------------------------------

def _conv_stats_kernel(x_ref, w_ref, sum_ref, ssq_ref):
    """Per-tile pre-bias matmul; emit per-tile partial sum / sum-of-squares (f32)."""
    pre = jnp.dot(x_ref[...], w_ref[...], preferred_element_type=jnp.float32)  # (tile_m, OCp)
    s = jnp.sum(pre, axis=0, keepdims=True)            # (1, OCp)
    q = jnp.sum(pre * pre, axis=0, keepdims=True)      # (1, OCp)
    # Output block is (1, 8, OCp) so the trailing dims stay (8, 128)-aligned; the wrapper only
    # consumes sublane 0 (broadcast keeps the tiny store unmasked / lane-dense).
    sum_ref[...] = jnp.broadcast_to(s, sum_ref.shape)
    ssq_ref[...] = jnp.broadcast_to(q, ssq_ref.shape)


def _conv_bn_lrelu_kernel(x_ref, w_ref, scale_ref, shift_ref, o_ref, *, alpha):
    """Recompute the matmul tile and apply the folded BN affine + LeakyReLU."""
    pre = jnp.dot(x_ref[...], w_ref[...], preferred_element_type=jnp.float32)  # (tile_m, OCp)
    z = pre * scale_ref[...] + shift_ref[...]
    # LeakyReLU with 0 <= alpha < 1: max(z, alpha*z) == z if z >= 0 else alpha*z (single VPU max).
    o_ref[...] = jnp.maximum(z, alpha * z)


# ------------------------------ JAX wrapper -----------------------------------

def _round_up(a, b):
    return (a + b - 1) // b * b


def _im2col(x, kh, kw, stride, pad):
    """x: [N, C, H, W] -> patches [N*OH*OW, C*KH*KW] (feature index = c*KH*KW + i*KW + j)."""
    # TODO(synk): im2col is still materialized by XLA; an in-kernel gather over a padded NHWC
    # input (per-(kh,kw) shifted matmuls) would remove the ~KH*KW/stride^2 duplication.
    x = jnp.pad(x, ((0, 0), (0, 0), (pad, pad), (pad, pad)))
    n, c, h, w = x.shape
    oh = (h - kh) // stride + 1
    ow = (w - kw) // stride + 1
    cols = []
    for i in range(kh):
        for j in range(kw):
            cols.append(x[:, :, i:i + stride * oh:stride, j:j + stride * ow:stride])
    patches = jnp.stack(cols, axis=2)                    # [N, C, KH*KW, OH, OW]
    patches = patches.transpose(0, 3, 4, 1, 2)           # [N, OH, OW, C, KH*KW]
    return patches.reshape(n * oh * ow, c * kh * kw), oh, ow


def _pick_tile_m(tile_m, m, k, oc_pad, vmem_budget):
    """Largest tile_m (multiple of 16, <= requested) whose working set fits the VMEM budget."""
    tile_m = _round_up(min(tile_m, _round_up(m, 16)), 16)

    def footprint(tm):
        # double-buffered bf16 X tile + (resident) bf16 W x2 + double-buffered f32 out tile + slack
        return (2 * tm * k * 2) + (2 * k * oc_pad * 2) + (2 * tm * oc_pad * 4) + (1 << 20)

    while tile_m > 16 and footprint(tile_m) > vmem_budget:
        tile_m = max(16, _round_up(tile_m // 2, 16))
    return tile_m


def basic_conv_forward(x, weight, bias, gamma, beta, *, stride=2, padding=1,
                       eps=1e-5, alpha=0.2, tile_m=512):
    """Forward of BasicConv. x: [N, C, H, W] (NCHW, float32). Returns [N, OC, OH, OW]."""
    oc, c, kh, kw = weight.shape
    n = x.shape[0]

    # bf16 before im2col: halves the XLA-materialized patch array (values identical to casting
    # after, since the cast happens elementwise anyway for the MXU operands).
    x_cols, oh, ow = _im2col(x.astype(jnp.bfloat16), kh, kw, stride, padding)   # [M, K] bf16
    m, k = x_cols.shape

    # --- tiling / padding (lane-dense OC, bf16-friendly sublane multiples, ragged M) ---
    oc_pad = _round_up(oc, 128)
    vmem_limit = 48 * 1024 * 1024
    tile_m = _pick_tile_m(tile_m, m, k, oc_pad, vmem_budget=40 * 1024 * 1024)
    m_pad = _round_up(m, tile_m)
    t = m_pad // tile_m

    x_cols_b = jnp.pad(x_cols, ((0, m_pad - m), (0, 0)))                                 # [Mp, K]
    w_mat = jnp.pad(weight.reshape(oc, c * kh * kw).T.astype(jnp.bfloat16),
                    ((0, 0), (0, oc_pad - oc)))                                          # [K, OCp]

    def _pad_row(v):
        return jnp.pad(v.astype(jnp.float32).reshape(1, oc), ((0, 0), (0, oc_pad - oc)))

    b_row, g_row, be_row = _pad_row(bias), _pad_row(gamma), _pad_row(beta)

    cparams = pltpu.CompilerParams(
        dimension_semantics=("parallel",),          # no resident accumulators -> megacore-safe
        vmem_limit_bytes=vmem_limit,
    )

    # -------- Pass 1: matmul + per-tile partial channel stats (no Y written to HBM) --------
    psum, pssq = pl.pallas_call(
        _conv_stats_kernel,
        out_shape=(
            jax.ShapeDtypeStruct((t, 8, oc_pad), jnp.float32),
            jax.ShapeDtypeStruct((t, 8, oc_pad), jnp.float32),
        ),
        grid_spec=pltpu.PrefetchScalarGridSpec(
            num_scalar_prefetch=0,
            grid=(t,),
            in_specs=[
                pl.BlockSpec((tile_m, k), lambda i: (i, 0)),
                pl.BlockSpec((k, oc_pad), lambda i: (0, 0)),
            ],
            out_specs=[
                pl.BlockSpec((1, 8, oc_pad), lambda i: (i, 0, 0)),
                pl.BlockSpec((1, 8, oc_pad), lambda i: (i, 0, 0)),
            ],
        ),
        compiler_params=cparams,
    )(x_cols_b, w_mat)

    # -------- Fold stats + bias + gamma/beta into one per-channel scale & shift (tiny, f32) --------
    count = jnp.float32(m)                                   # true row count (excludes padding)
    mean_pre = jnp.sum(psum[:, 0, :], axis=0) / count        # (OCp,)  mean of pre-bias conv
    ex2 = jnp.sum(pssq[:, 0, :], axis=0) / count
    var = jnp.maximum(ex2 - mean_pre * mean_pre, 0.0)        # biased variance (train-mode BN);
                                                             # bias shift doesn't change variance
    scale = g_row[0] * jax.lax.rsqrt(var + eps)              # (OCp,)
    mean_y = mean_pre + b_row[0]                             # batch mean of y = pre + bias
    shift = (b_row[0] - mean_y) * scale + be_row[0]          # z = pre*scale + shift
    scale_row = scale.reshape(1, oc_pad)
    shift_row = shift.reshape(1, oc_pad)

    # -------- Pass 2: recompute matmul, apply BN affine + LeakyReLU, lane-dense store --------
    out_flat = pl.pallas_call(
        functools.partial(_conv_bn_lrelu_kernel, alpha=alpha),
        out_shape=jax.ShapeDtypeStruct((m_pad, oc_pad), jnp.float32),
        grid_spec=pltpu.PrefetchScalarGridSpec(
            num_scalar_prefetch=0,
            grid=(t,),
            in_specs=[
                pl.BlockSpec((tile_m, k), lambda i: (i, 0)),
                pl.BlockSpec((k, oc_pad), lambda i: (0, 0)),
                pl.BlockSpec((1, oc_pad), lambda i: (0, 0)),
                pl.BlockSpec((1, oc_pad), lambda i: (0, 0)),
            ],
            out_specs=pl.BlockSpec((tile_m, oc_pad), lambda i: (i, 0)),
        ),
        compiler_params=cparams,
    )(x_cols_b, w_mat, scale_row, shift_row)

    # Crop padding, back to NCHW for module-boundary fidelity.
    # TODO(synk): keep NHWC at the boundary (and drop this XLA transpose) if the surrounding
    # model can consume NHWC.
    out = out_flat[:m, :oc].reshape(n, oh, ow, oc).transpose(0, 3, 1, 2)
    return out
    # TODO(synk): BatchNorm running_mean/running_var updates are training-only state and do not
    # affect the forward output; they are not materialized here.


# ------------------------------ reference + main -------------------------------

def _reference(x, weight, bias, gamma, beta, *, stride=2, padding=1, eps=1e-5, alpha=0.2):
    y = jax.lax.conv_general_dilated(
        x, weight, (stride, stride), [(padding, padding), (padding, padding)],
        dimension_numbers=("NCHW", "OIHW", "NCHW"))
    y = y + bias[None, :, None, None]
    mean = y.mean(axis=(0, 2, 3), keepdims=True)
    var = y.var(axis=(0, 2, 3), keepdims=True)   # biased, matches train-mode normalization
    z = (y - mean) * jax.lax.rsqrt(var + eps) * gamma[None, :, None, None] + beta[None, :, None, None]
    return jnp.where(z >= 0, z, alpha * z)


if __name__ == "__main__":
    key = jax.random.PRNGKey(0)
    k_x, k_w, k_b, k_g, k_be = jax.random.split(key, 5)

    N, C_IN, H, W = 2, 4, 16, 16
    C_OUT, KSIZE, STRIDE, PAD = 8, 4, 2, 1   # Pix2Pix-style BasicConv(4, 8, 4, stride=2, padding=1)

    x = jax.random.normal(k_x, (N, C_IN, H, W), dtype=jnp.float32)
    weight = jax.random.normal(k_w, (C_OUT, C_IN, KSIZE, KSIZE), dtype=jnp.float32) * 0.1
    bias = jax.random.normal(k_b, (C_OUT,), dtype=jnp.float32) * 0.1
    gamma = 1.0 + 0.1 * jax.random.normal(k_g, (C_OUT,), dtype=jnp.float32)
    beta = 0.1 * jax.random.normal(k_be, (C_OUT,), dtype=jnp.float32)

    out = basic_conv_forward(x, weight, bias, gamma, beta, stride=STRIDE, padding=PAD)
    out = jax.block_until_ready(out)

    ref = _reference(x, weight, bias, gamma, beta, stride=STRIDE, padding=PAD)
    assert out.shape == ref.shape, (out.shape, ref.shape)
    # Tolerance accounts for bf16 MXU operands (f32 accumulation); error stays well below 1e-2.
    assert jnp.allclose(out, ref, atol=2e-2, rtol=2e-2), float(jnp.max(jnp.abs(out - ref)))

    print("KERNEL_OK")
</pallas_src>

<mosaic_0001>
module attributes {stable_mosaic.version = 11 : i64} {
  func.func @_conv_stats_kernel(%arg0: i32, %arg1: memref<128x64xbf16, #tpu.memory_space<vmem>>, %arg2: memref<64x128xbf16, #tpu.memory_space<vmem>>, %arg3: memref<1x8x128xf32, #tpu.memory_space<vmem>>, %arg4: memref<1x8x128xf32, #tpu.memory_space<vmem>>) attributes {dimension_semantics = [#tpu.dimension_semantics<parallel>], iteration_bounds = array<i64: 1>, scalar_prefetch = 0 : i64, scratch_operands = 0 : i64, tpu.core_type = #tpu.core_type<tc>, window_params = [{transform_indices = @transform_0, window_bounds = array<i64: 128, 64>}, {pipeline_mode = #tpu.pipeline_mode<synchronous>, transform_indices = @transform_1, window_bounds = array<i64: 64, 128>}, {transform_indices = @transform_2, window_bounds = array<i64: 1, 8, 128>}, {transform_indices = @transform_3, window_bounds = array<i64: 1, 8, 128>}]} {
    %c0 = arith.constant 0 : index
    %c0_0 = arith.constant 0 : index
    %0 = vector.load %arg1[%c0, %c0_0] : memref<128x64xbf16, #tpu.memory_space<vmem>>, vector<128x64xbf16>
    %c0_1 = arith.constant 0 : index
    %c0_2 = arith.constant 0 : index
    %1 = vector.load %arg2[%c0_1, %c0_2] : memref<64x128xbf16, #tpu.memory_space<vmem>>, vector<64x128xbf16>
    %cst = arith.constant dense<0.000000e+00> : vector<128x128xf32>
    %2 = tpu.matmul %0, %1, %cst {dimension_numbers = #tpu.dot_dimension_numbers<[1], [0], [0], [1], [0, 0, 1, 1], [], []>} : vector<128x64xbf16>, vector<64x128xbf16>, vector<128x128xf32> -> vector<128x128xf32>
    %cst_3 = arith.constant dense<0.000000e+00> : vector<128xf32>
    %3 = vector.multi_reduction <add>, %2, %cst_3 [0] : vector<128x128xf32> to vector<128xf32>
    %4 = vector.shape_cast %3 : vector<128xf32> to vector<1x128xf32>
    %5 = arith.mulf %2, %2 : vector<128x128xf32>
    %cst_4 = arith.constant dense<0.000000e+00> : vector<128xf32>
    %6 = vector.multi_reduction <add>, %5, %cst_4 [0] : vector<128x128xf32> to vector<128xf32>
    %7 = vector.shape_cast %6 : vector<128xf32> to vector<1x128xf32>
    %8 = vector.shape_cast %4 : vector<1x128xf32> to vector<1x1x128xf32>
    %9 = vector.broadcast %8 : vector<1x1x128xf32> to vector<1x8x128xf32>
    %c0_5 = arith.constant 0 : index
    %c0_6 = arith.constant 0 : index
    %c0_7 = arith.constant 0 : index
    %10 = vector.load %arg3[%c0_5, %c0_6, %c0_7] : memref<1x8x128xf32, #tpu.memory_space<vmem>>, vector<1x8x128xf32>
    tpu.vector_store %arg3[%c0_5, %c0_6, %c0_7], %9 {strides = array<i32>} : memref<1x8x128xf32, #tpu.memory_space<vmem>>, vector<1x8x128xf32>,
    %11 = vector.shape_cast %7 : vector<1x128xf32> to vector<1x1x128xf32>
    %12 = vector.broadcast %11 : vector<1x1x128xf32> to vector<1x8x128xf32>
    %c0_8 = arith.constant 0 : index
    %c0_9 = arith.constant 0 : index
    %c0_10 = arith.constant 0 : index
    %13 = vector.load %arg4[%c0_8, %c0_9, %c0_10] : memref<1x8x128xf32, #tpu.memory_space<vmem>>, vector<1x8x128xf32>
    tpu.vector_store %arg4[%c0_8, %c0_9, %c0_10], %12 {strides = array<i32>} : memref<1x8x128xf32, #tpu.memory_space<vmem>>, vector<1x8x128xf32>,
    return
  }
  func.func @transform_0(%arg0: i32) -> (i32, i32) {
    %c0_i32 = arith.constant 0 : i32
    %c0_i32_0 = arith.constant 0 : i32
    return %arg0, %c0_i32 : i32, i32
  }
  func.func @transform_1(%arg0: i32) -> (i32, i32) {
    %c0_i32 = arith.constant 0 : i32
    %c0_i32_0 = arith.constant 0 : i32
    %c0_i32_1 = arith.constant 0 : i32
    return %c0_i32, %c0_i32_0 : i32, i32
  }
  func.func @transform_2(%arg0: i32) -> (i32, i32, i32) {
    %c0_i32 = arith.constant 0 : i32
    %c0_i32_0 = arith.constant 0 : i32
    %c0_i32_1 = arith.constant 0 : i32
    return %arg0, %c0_i32, %c0_i32_0 : i32, i32, i32
  }
  func.func @transform_3(%arg0: i32) -> (i32, i32, i32) {
    %c0_i32 = arith.constant 0 : i32
    %c0_i32_0 = arith.constant 0 : i32
    %c0_i32_1 = arith.constant 0 : i32
    return %arg0, %c0_i32, %c0_i32_0 : i32, i32, i32
  }
}

</mosaic_0001>

<bundles_post_ra>
// kernel: tpu_custom_call.1
= control target key start
LH: loop header
LB: loop body
LE: loop exit
PB: predicated region body
PF: predicated region fallthrough
CT: control target
= control target key end

     0   :  { %9 = vsyncpa [#allocation3], 0  ;;  %vm104_vm0 = vcmask 523264   ;;  %s530_s0 = inlined_call_operand.vmem [shape: bf16[128,64], index: 0, kind: input, shape index: {}]   ;;  %s531_s1 = inlined_call_operand.vmem [shape: bf16[64,128], index: 1, kind: input, shape index: {}]   ;;  %s532_s2 = inlined_call_operand.hbm [shape: f32[1,8,128], index: 2, kind: output, shape index: {0}]   ;;  %s533_s3 = inlined_call_operand.hbm [shape: f32[1,8,128], index: 3, kind: output, shape index: {1}]  }
   0x1   :  { %v380_v0 = vld [vmem:[%s531_s1] sm:$0xff]   ;;  %v381_v1 = vld [vmem:[%s531_s1 + $0x8] sm:$0xff]   ;;  %v382_v2 = vld [vmem:[%s531_s1 + $0x10] sm:$0xff]  }
   0x2   :  { %346 = vmatprep.subr.bf16.mxu0 %v380_v0  ;;  %370 = vmatprep.subr.bf16.mxu1 %v380_v0  ;;  %v384_v3 = vld [vmem:[%s530_s0] sm:$0xff]   ;;  %v383_v4 = vld [vmem:[%s531_s1 + $0x18] sm:$0xff]  }
   0x3   :  { %347 = vmatpush3.bf16.msra.mxu0 %v380_v0  ;;  %374 = vmatpush3.bf16.msra.mxu1 %v380_v0  ;;  %v388_v5 = vld [vmem:[%s530_s0 + $0x20] sm:$0xff]  }
   0x4   :  { %348 = vmatprep.subr.bf16.mxu0 %v381_v1  ;;  %371 = vmatprep.subr.bf16.mxu1 %v381_v1 }
   0x5   :  { %354 = vmatprep.mubr.msk.bf16.mxu0 %vm104_vm0, %v384_v3  ;;  %362 = vmatprep.mubr.msk.bf16.mxu1 %vm104_vm0, %v388_v5 }
   0x7   :  { %349 = vmatpush3.bf16.msra.mxu0 %v381_v1  ;;  %375 = vmatpush3.bf16.msra.mxu1 %v381_v1 }
   0x8   :  { %350 = vmatprep.subr.bf16.mxu0 %v382_v2  ;;  %372 = vmatprep.subr.bf16.mxu1 %v382_v2 }
   0xb   :  { %351 = vmatpush3.bf16.msra.mxu0 %v382_v2  ;;  %376 = vmatpush3.bf16.msra.mxu1 %v382_v2 }
   0xc   :  { %352 = vmatprep.subr.bf16.mxu0 %v383_v4  ;;  %373 = vmatprep.subr.bf16.mxu1 %v383_v4 }
   0xd   :  { %10 = vsyncpa [#allocation5], 0  ;;  %v385_v6 = vld [vmem:[%s530_s0 + $0x8] sm:$0xff]   ;;  %v386_v8 = vld [vmem:[%s530_s0 + $0x10] sm:$0xff]   ;;  %s441_s9 = smov [#allocation4]  }
   0xe   :  { %v389_v7 = vld [vmem:[%s530_s0 + $0x28] sm:$0xff]   ;;  %v390_v9 = vld [vmem:[%s530_s0 + $0x30] sm:$0xff]   ;;  %v387_v10 = vld [vmem:[%s530_s0 + $0x18] sm:$0xff]   ;;  %s302_s10 = sshll.u32 %s441_s9, 4  ;;  %s303_s10 = int_to_ptr.vmem [resolvable:$true] %s302_s10 }
   0xf   :  { %353 = vmatpush3.bf16.msra.mxu0 %v383_v4  ;;  %377 = vmatpush3.bf16.msra.mxu1 %v383_v4  ;;  %v391_v11 = vld [vmem:[%s530_s0 + $0x38] sm:$0xff]   ;;  %s440_s0 = smov [#allocation2]  }
  0x10   :  { %s292_s8 = sshll.u32 %s440_s0, 4  ;;  %s293_s8 = int_to_ptr.vmem [resolvable:$true] %s292_s8 }
  0x11   :  { %s392_s11 = scalar_lea.vmem %s293_s8, 128  ;;  %p397_p1 = scmp.lt.s32.totalorder %s293_s8, %s293_s8 }
  0x12   :  { %355 = vmatmul.mubr.msk.bf16.vlgmr.msra.gmra.mrb[0].mxu0 %vm104_vm0, %v385_v6  ;;  %363 = vmatmul.mubr.msk.bf16.vlgmr.msra.gmra.mrb[0].mxu1 %vm104_vm0, %v389_v7  ;;  %p393_p0 = scmp.ne.s32.totalorder %s293_s8, %s392_s11  ;;  %p398_p2 = scmp.lt.s32.totalorder %s392_s11, %s392_s11 }
  0x13   :  { %358 = vmatprep.mubr.msk.bf16.mxu0 %vm104_vm0, %v386_v8  ;;  %366 = vmatprep.mubr.msk.bf16.mxu1 %vm104_vm0, %v390_v9 }
  0x14   :  { %p399_p3 = por %p398_p2, %p397_p1 }
  0x16   :  { %p400_p4 = pnand %p399_p3, %p393_p0 }
  0x1a   :  { %359 = vmatmul.mubr.msk.bf16.gmra.mrb[4].mxu0 %vm104_vm0, %v387_v10  ;;  %367 = vmatmul.mubr.msk.bf16.gmra.mrb[4].mxu1 %vm104_vm0, %v391_v11 }
  0xe5   :  { %v356_v12 = vpop.f32.mrb[0].mxu0  ;;  %v364_v13 = vpop.f32.mrb[0].mxu1 }
  0xe6   :  { %v163_v14 = vpop.f32.mrb[1].mxu0  ;;  %v195_v15 = vpop.f32.mrb[1].mxu1  ;;  %v249_v23 = vmul.f32 %v356_v12, %v356_v12  ;;  %v257_v55 = vmul.f32 %v364_v13, %v364_v13 }
  0xe7   :  { %v357_v16 = vpop.f32.mrb[2].mxu0  ;;  %v365_v17 = vpop.f32.mrb[2].mxu1  ;;  %v247_v20 = vmul.f32 %v163_v14, %v163_v14  ;;  %v255_v49 = vmul.f32 %v195_v15, %v195_v15 }
  0xe8   :  { %v166_v18 = vpop.f32.mrb[3].mxu0  ;;  %v198_v19 = vpop.f32.mrb[3].mxu1  ;;  %v250_v26 = vmul.f32 %v357_v16, %v357_v16  ;;  %v258_v58 = vmul.f32 %v365_v17, %v365_v17 }
  0xe9   :  { %v226_v21 = vadd.f32 %v166_v18, %v163_v14  ;;  %v248_v22 = vmul.f32 %v166_v18, %v166_v18  ;;  %v256_v54 = vmul.f32 %v198_v19, %v198_v19 }
  0xeb   :  { %v227_v24 = vadd.f32 %v356_v12, %v226_v21  ;;  %v263_v25 = vadd.f32 %v248_v22, %v247_v20 }
  0xed   :  { %v264_v27 = vadd.f32 %v263_v25, %v249_v23  ;;  %v360_v28 = vpop.f32.mrb[4].mxu0  ;;  %v228_v29 = vadd.f32 %v357_v16, %v227_v24  ;;  %v368_v30 = vpop.f32.mrb[4].mxu1 }
  0xee   :  { %v179_v31 = vpop.f32.mrb[5].mxu0  ;;  %v211_v32 = vpop.f32.mrb[5].mxu1  ;;  %v253_v43 = vmul.f32 %v360_v28, %v360_v28  ;;  %v261_v3 = vmul.f32 %v368_v30, %v368_v30 }
  0xef   :  { %v229_v33 = vadd.f32 %v228_v29, %v179_v31  ;;  %v251_v34 = vmul.f32 %v179_v31, %v179_v31  ;;  %v265_v35 = vadd.f32 %v264_v27, %v250_v26  ;;  %v361_v36 = vpop.f32.mrb[6].mxu0  ;;  %v369_v37 = vpop.f32.mrb[6].mxu1  ;;  %v259_v61 = vmul.f32 %v211_v32, %v211_v32 }
  0xf0   :  { %v182_v38 = vpop.f32.mrb[7].mxu0  ;;  %v214_v39 = vpop.f32.mrb[7].mxu1  ;;  %v254_v46 = vmul.f32 %v361_v36, %v361_v36  ;;  %v262_v6 = vmul.f32 %v369_v37, %v369_v37 }
  0xf1   :  { %v266_v40 = vadd.f32 %v265_v35, %v251_v34  ;;  %v230_v41 = vadd.f32 %v229_v33, %v182_v38  ;;  %v252_v42 = vmul.f32 %v182_v38, %v182_v38  ;;  %v260_v2 = vmul.f32 %v214_v39, %v214_v39 }
  0xf3   :  { %v231_v44 = vadd.f32 %v360_v28, %v230_v41  ;;  %v267_v45 = vadd.f32 %v266_v40, %v252_v42 }
  0xf5   :  { %v268_v47 = vadd.f32 %v267_v45, %v253_v43  ;;  %v232_v48 = vadd.f32 %v361_v36, %v231_v44 }
  0xf7   :  { %v233_v50 = vadd.f32 %v232_v48, %v195_v15  ;;  %v269_v51 = vadd.f32 %v268_v47, %v254_v46 }
  0xf9   :  { %v270_v52 = vadd.f32 %v269_v51, %v255_v49  ;;  %v234_v53 = vadd.f32 %v233_v50, %v198_v19 }
  0xfb   :  { %v235_v56 = vadd.f32 %v364_v13, %v234_v53  ;;  %v271_v57 = vadd.f32 %v270_v52, %v256_v54 }
  0xfd   :  { %v272_v59 = vadd.f32 %v271_v57, %v257_v55  ;;  %v236_v60 = vadd.f32 %v365_v17, %v235_v56 }
  0xff   :  { %v237_v62 = vadd.f32 %v236_v60, %v211_v32  ;;  %v273_v63 = vadd.f32 %v272_v59, %v258_v58 }
 0x101   :  { %v274_v0 = vadd.f32 %v273_v63, %v259_v61  ;;  %v238_v1 = vadd.f32 %v237_v62, %v214_v39 }
 0x103   :  { %v239_v4 = vadd.f32 %v368_v30, %v238_v1  ;;  %v275_v5 = vadd.f32 %v274_v0, %v260_v2 }
 0x105   :  { %v240_v7 = vadd.f32 %v369_v37, %v239_v4  ;;  %v276_v8 = vadd.f32 %v275_v5, %v261_v3 }
 0x107   :  { %v241_v9 = vrot.slane %v240_v7, 4  ;;  %v277_v10 = vadd.f32 %v276_v8, %v262_v6 }
 0x109   :  { %v242_v11 = vadd.f32 %v241_v9, %v240_v7  ;;  %v278_v12 = vrot.slane %v277_v10, 4 }
 0x10b   :  { %v243_v13 = vrot.slane %v242_v11, 2  ;;  %v279_v14 = vadd.f32 %v278_v12, %v277_v10 }
 0x10d   :  { %v244_v15 = vadd.f32 %v243_v13, %v242_v11  ;;  %v280_v16 = vrot.slane %v279_v14, 2 }
 0x10f   :  { %v245_v17 = vrot.slane %v244_v15, 1  ;;  %v281_v18 = vadd.f32 %v280_v16, %v279_v14 }
 0x111   :  { %v246_v19 = vadd.f32 %v245_v17, %v244_v15  ;;  %v282_v20 = vrot.slane %v281_v18, 1 }
 0x113   :  { %284 = vst [vmem:[#allocation2] sm:$0xff] %v246_v19  ;;  %v283_v21 = vadd.f32 %v282_v20, %v281_v18 }
 0x114   :  { %403 = shalt.err (!%p400_p4)
}
 0x115   :  { %s404_s14 = scalar_lea.hbm %s532_s2, 128 }
 0x116   :  { %p405_p5 = scmp.ne.s32.totalorder %s532_s2, %s404_s14  ;;  %p408_p6 = scmp.lt.u32.totalorder %s404_s14, %s532_s2 }
 0x118   :  { %p410_p7 = pnand %p408_p6, %p405_p5 }
 0x11a   :  { %413 = shalt.err (!%p410_p7)
}
 0x11b   :  { %295 = dma.vmem_to_hbm [thread:$0]  %s293_s8, 128, %s532_s2, [#allocation3]   ;;  %285 = vst [vmem:[#allocation4] sm:$0xff] %v283_v21 }
 0x11c   :  { %s414_s21 = scalar_lea.vmem %s303_s10, 128  ;;  %p419_p9 = scmp.lt.s32.totalorder %s303_s10, %s303_s10 }
 0x11d   :  { %p415_p8 = scmp.ne.s32.totalorder %s303_s10, %s414_s21  ;;  %p420_p10 = scmp.lt.s32.totalorder %s414_s21, %s414_s21 }
 0x11f   :  { %p421_p11 = por %p420_p10, %p419_p9 }
 0x121   :  { %p422_p12 = pnand %p421_p11, %p415_p8 }
 0x123   :  { %425 = shalt.err (!%p422_p12)
}
 0x124   :  { %s426_s24 = scalar_lea.hbm %s533_s3, 128 }
 0x125   :  { %p427_p13 = scmp.ne.s32.totalorder %s533_s3, %s426_s24  ;;  %p430_p0 = scmp.lt.u32.totalorder %s426_s24, %s533_s3 }
 0x127   :  { %p432_p1 = pnand %p430_p0, %p427_p13 }
 0x129   :  { %435 = shalt.err (!%p432_p1)
}
 0x12a   :  { %305 = dma.vmem_to_hbm [thread:$0]  %s303_s10, 128, %s533_s3, [#allocation5]  }
 0x12b   :  { %436 = dma.done.wait [#allocation3], 128  }
 0x12c   :  { %437 = vsyncadd [#allocation3], 4294967168 }
 0x12d   :  { %438 = dma.done.wait [#allocation5], 128  }
 0x12e   :  { %439 = vsyncadd [#allocation5], 4294967168 }
 0x12f   :  { %312 = vsyncpa [#allocation3], 1 }
 0x130   :  { %313 = vsyncpa [#allocation5], 1 }

</bundles_post_ra>
